<compile_context>
chip_gen: v7x
topology: tpu7x:2x2x1
jax: 0.10.0
libtpu: 0.0.40
codegen_flags: <defaults>
</compile_context>

<pallas_src>
import jax
import jax.numpy as jnp
from jax.experimental import pallas as pl
from jax.experimental.pallas import tpu as pltpu

# ----------------------------- configuration -------------------------------
IN_CHANNELS  = 4
BASE_FILTERS = 8
KERNEL_SIZE  = 3
NUM_LAYERS   = 4
LATENT_DIM   = 16
SEQ_LEN      = 16
DROPOUT      = 0.1          # eval-mode -> identity
NORM_OUTPUTS = True
BN_EPS       = 1e-5


def _channel_plan():
    # (cin, cout, use_left_padding) per conv layer, mirroring _build_encoder()
    plan = [(IN_CHANNELS, BASE_FILTERS, False)]
    for i in range(1, NUM_LAYERS):
        cin  = min(i * BASE_FILTERS, 64)
        cout = min((i + 1) * BASE_FILTERS, 64)
        plan.append((cin, cout, i % 2 == 1))
    return plan


PLAN     = _channel_plan()
CUT_OFF  = NUM_LAYERS // 2 * (KERNEL_SIZE - KERNEL_SIZE % 2)
L_FINAL  = SEQ_LEN - CUT_OFF
C_FINAL  = min(NUM_LAYERS * BASE_FILTERS, 64)
FLAT_DIM = L_FINAL * C_FINAL


def _length_plan():
    # Static per-layer input lengths (for sizing the padding scratch).
    lens, L = [], SEQ_LEN
    for (_, _, use_pad) in PLAN:
        lens.append(L)
        L = L + (KERNEL_SIZE - 1 if use_pad else 0) - KERNEL_SIZE + 1
    return lens, L


IN_LENS, _LFIN = _length_plan()
assert _LFIN == L_FINAL

KC_MAX = max(KERNEL_SIZE * cin for (cin, _, _) in PLAN)          # 72
C_MAX  = max(cout for (_, cout, _) in PLAN)                      # 32
PAD_L  = max([IN_LENS[i] + KERNEL_SIZE - 1
              for i in range(NUM_LAYERS) if PLAN[i][2]],
             default=SEQ_LEN)                                    # 16


# ------------------------------- kernel ------------------------------------
def encoder_kernel(x_ref, w_ref, sb_ref, lin_ref, out_ref, pad_ref):
    # x_ref   : (B, SEQ_LEN, IN_CHANNELS)     activations, channels-last
    # w_ref   : (NUM_LAYERS, KC_MAX, C_MAX)   im2col conv weights, zero-padded
    # sb_ref  : (NUM_LAYERS, 2, C_MAX)        folded-BN [scale; bias]
    # lin_ref : (FLAT_DIM + 1, LATENT_DIM)    [linear weight rows; bias row]
    # out_ref : (B, LATENT_DIM)
    # pad_ref : (B, PAD_L, C_MAX)             VMEM scratch for causal left-pad
    B = x_ref.shape[0]
    K = KERNEL_SIZE

    # Zero the padding scratch once; only its first K-1 rows are ever read
    # without having been re-written.
    pad_ref[...] = jnp.zeros(pad_ref.shape, dtype=pad_ref.dtype)

    # Hoist all parameter loads out of the per-sample loop (no CSE in-kernel).
    ws, scs, bis = [], [], []
    for li, (cin, cout, _) in enumerate(PLAN):
        ws.append(w_ref[li, 0:K * cin, 0:cout])      # (K*cin, cout)
        scs.append(sb_ref[li, 0:1, 0:cout])          # (1, cout)
        bis.append(sb_ref[li, 1:2, 0:cout])          # (1, cout)
    lw = lin_ref[0:FLAT_DIM, :]                      # (FLAT_DIM, LATENT_DIM)
    lb = lin_ref[FLAT_DIM:FLAT_DIM + 1, :]           # (1, LATENT_DIM)

    flat_rows = []
    for b in range(B):                               # B tiny & static -> unrolled
        h = x_ref[b]                                 # (L, cin) f32
        for li, (cin, cout, use_pad) in enumerate(PLAN):
            lcur = h.shape[0]
            if use_pad:
                # ConstantPad1d((K-1, 0), 0.0): store into the pre-zeroed
                # scratch at row offset K-1 and read back the padded window.
                pad_ref[b, K - 1:K - 1 + lcur, 0:cin] = h
                h = pad_ref[b, 0:lcur + K - 1, 0:cin]
                lcur = lcur + K - 1
            lout = lcur - K + 1
            # im2col: lane-axis concat of the K shifted windows, then ONE
            # matmul with contraction depth K*cin (instead of K tiny matmuls).
            h_cat = jnp.concatenate([h[k:k + lout, :] for k in range(K)],
                                    axis=-1)                       # (lout, K*cin)
            acc = jnp.dot(h_cat, ws[li], preferred_element_type=jnp.float32)
            # Folded BatchNorm1d (eval) + ReLU; Dropout2d is identity in eval.
            h = jnp.maximum(acc * scs[li] + bis[li], 0.0)          # (lout, cout)
        # Flatten in (l, c) order (linear weight was permuted to match).
        flat_rows.append(
            jnp.concatenate([h[l:l + 1, :] for l in range(L_FINAL)], axis=-1))

    h_flat = jnp.concatenate(flat_rows, axis=0)      # (B, FLAT_DIM)
    # Single batched Linear: (B, 384) @ (384, 16) + bias.
    out = jnp.dot(h_flat, lw, preferred_element_type=jnp.float32) + lb
    if NORM_OUTPUTS:
        ssq = jnp.sum(out * out, axis=1, keepdims=True)
        # rsqrt on the EUP; clamp == max(norm, 1e-12), guards the all-zero-row
        # NaN hazard and is identical to the PyTorch forward for nonzero rows.
        out = out * jax.lax.rsqrt(jnp.maximum(ssq, 1e-24))
    out_ref[...] = out
    # TODO(synk): training-mode BatchNorm batch statistics and Dropout2d masks
    # are not modeled (eval-mode semantics only).


# ------------------------------ parameters ---------------------------------
def init_params(key):
    keys = jax.random.split(key, NUM_LAYERS + 1)
    convs = []
    for li, (cin, cout, _) in enumerate(PLAN):
        fan_in = cin * KERNEL_SIZE
        bound = 1.0 / float(fan_in) ** 0.5
        w = jax.random.uniform(keys[li], (cout, cin, KERNEL_SIZE),
                               jnp.float32, -bound, bound)   # PyTorch layout
        # Deterministic BN params / running stats, folded (eval mode):
        gamma  = 1.0 + 0.01 * jnp.arange(cout, dtype=jnp.float32)
        beta   = 0.01 * jnp.arange(cout, dtype=jnp.float32)
        r_mean = 0.005 * jnp.arange(cout, dtype=jnp.float32)
        r_var  = 1.0 + 0.02 * jnp.arange(cout, dtype=jnp.float32)
        scale = gamma / jnp.sqrt(r_var + BN_EPS)
        bias  = beta - r_mean * scale
        convs.append((w, scale, bias))
    kw, kb = jax.random.split(keys[-1])
    bound = 1.0 / float(FLAT_DIM) ** 0.5
    lin_w = jax.random.uniform(kw, (LATENT_DIM, FLAT_DIM), jnp.float32, -bound, bound)
    lin_b = jax.random.uniform(kb, (LATENT_DIM,), jnp.float32, -bound, bound)
    return convs, lin_w, lin_b


def pack_params(convs, lin_w, lin_b):
    """Pack all parameters into 3 slabs (3 input DMAs instead of ~14)."""
    w_slab  = jnp.zeros((NUM_LAYERS, KC_MAX, C_MAX), jnp.float32)
    sb_slab = jnp.zeros((NUM_LAYERS, 2, C_MAX), jnp.float32)
    for li, (w, scale, bias) in enumerate(convs):
        cout, cin, K = w.shape
        # im2col weight: row index = k*cin + c_in  (matches the kernel's concat).
        w_im = jnp.transpose(w, (2, 1, 0)).reshape(K * cin, cout)
        w_slab  = w_slab.at[li, :K * cin, :cout].set(w_im)
        sb_slab = sb_slab.at[li, 0, :cout].set(scale)
        sb_slab = sb_slab.at[li, 1, :cout].set(bias)
    # PyTorch Flatten on (B, C, L) uses flat index c*L + l; permute so the
    # kernel's (l, c)-order flatten matches, then append the bias as last row.
    lin_w_p = (lin_w.reshape(LATENT_DIM, C_FINAL, L_FINAL)
                    .transpose(2, 1, 0)
                    .reshape(FLAT_DIM, LATENT_DIM))
    lin_slab = jnp.concatenate([lin_w_p, lin_b.reshape(1, LATENT_DIM)], axis=0)
    return w_slab, sb_slab, lin_slab


# -------------------------------- wrapper -----------------------------------
def encoder_forward(x_ncl, w_slab, sb_slab, lin_slab):
    # x_ncl: (B, C, L) like PyTorch; kernel uses channels-last (B, L, C).
    x_blc = jnp.transpose(x_ncl, (0, 2, 1)).astype(jnp.float32)
    B = x_ncl.shape[0]
    vmem = pl.BlockSpec(memory_space=pltpu.MemorySpace.VMEM)
    # Total resident data is << 1 MiB, so no grid/tiling or vmem_limit_bytes is
    # needed at this size.  If batch / seq_len are scaled up, add a grid over
    # the batch dim (BlockSpec (TB, L, C), dimension_semantics=("parallel",))
    # to use v7x's second TensorCore and stay under the scoped-VMEM limit.
    return pl.pallas_call(
        encoder_kernel,
        out_shape=jax.ShapeDtypeStruct((B, LATENT_DIM), jnp.float32),
        in_specs=[vmem, vmem, vmem, vmem],
        out_specs=vmem,
        scratch_shapes=[pltpu.VMEM((B, PAD_L, C_MAX), jnp.float32)],
    )(x_blc, w_slab, sb_slab, lin_slab)


# --------------------------------- main -------------------------------------
if __name__ == "__main__":
    key = jax.random.PRNGKey(0)
    kx, kp = jax.random.split(key)
    # PyTorch-style NCL input: (batch=2, in_channels=4, seq_len=16)
    x = jax.random.normal(kx, (2, IN_CHANNELS, SEQ_LEN), jnp.float32)
    convs, lin_w, lin_b = init_params(kp)
    w_slab, sb_slab, lin_slab = pack_params(convs, lin_w, lin_b)

    out = encoder_forward(x, w_slab, sb_slab, lin_slab)
    out = jax.block_until_ready(out)
    assert out.shape == (2, LATENT_DIM)
    assert bool(jnp.all(jnp.isfinite(out)))
    print("KERNEL_OK")
</pallas_src>

<mosaic_0001>
module attributes {stable_mosaic.version = 11 : i64} {
  func.func @encoder_kernel(%arg0: memref<2x16x4xf32, #tpu.memory_space<vmem>>, %arg1: memref<4x72x32xf32, #tpu.memory_space<vmem>>, %arg2: memref<4x2x32xf32, #tpu.memory_space<vmem>>, %arg3: memref<385x16xf32, #tpu.memory_space<vmem>>, %arg4: memref<2x16xf32, #tpu.memory_space<vmem>>, %arg5: memref<2x16x32xf32, #tpu.memory_space<vmem>>) attributes {dimension_semantics = [], scalar_prefetch = 0 : i64, scratch_operands = 1 : i64, tpu.core_type = #tpu.core_type<tc>} {
    %cst = arith.constant 0.000000e+00 : f32
    %0 = vector.broadcast %cst : f32 to vector<2x16x32xf32>
    %c0 = arith.constant 0 : index
    %c0_0 = arith.constant 0 : index
    %c0_1 = arith.constant 0 : index
    %1 = vector.load %arg5[%c0, %c0_0, %c0_1] : memref<2x16x32xf32, #tpu.memory_space<vmem>>, vector<2x16x32xf32>
    tpu.vector_store %arg5[%c0, %c0_0, %c0_1], %0 {strides = array<i32>} : memref<2x16x32xf32, #tpu.memory_space<vmem>>, vector<2x16x32xf32>,
    %c0_2 = arith.constant 0 : index
    %c0_3 = arith.constant 0 : index
    %c0_4 = arith.constant 0 : index
    %2 = vector.load %arg1[%c0_2, %c0_3, %c0_4] : memref<4x72x32xf32, #tpu.memory_space<vmem>>, vector<1x12x8xf32>
    %3 = vector.shape_cast %2 : vector<1x12x8xf32> to vector<12x8xf32>
    %c0_5 = arith.constant 0 : index
    %c0_6 = arith.constant 0 : index
    %c0_7 = arith.constant 0 : index
    %4 = vector.load %arg2[%c0_5, %c0_6, %c0_7] : memref<4x2x32xf32, #tpu.memory_space<vmem>>, vector<1x1x8xf32>
    %5 = vector.shape_cast %4 : vector<1x1x8xf32> to vector<1x8xf32>
    %c0_8 = arith.constant 0 : index
    %c1 = arith.constant 1 : index
    %c0_9 = arith.constant 0 : index
    %6 = vector.load %arg2[%c0_8, %c1, %c0_9] : memref<4x2x32xf32, #tpu.memory_space<vmem>>, vector<1x1x8xf32>
    %7 = vector.shape_cast %6 : vector<1x1x8xf32> to vector<1x8xf32>
    %c1_10 = arith.constant 1 : index
    %c0_11 = arith.constant 0 : index
    %c0_12 = arith.constant 0 : index
    %8 = vector.load %arg1[%c1_10, %c0_11, %c0_12] : memref<4x72x32xf32, #tpu.memory_space<vmem>>, vector<1x24x16xf32>
    %9 = vector.shape_cast %8 : vector<1x24x16xf32> to vector<24x16xf32>
    %c1_13 = arith.constant 1 : index
    %c0_14 = arith.constant 0 : index
    %c0_15 = arith.constant 0 : index
    %10 = vector.load %arg2[%c1_13, %c0_14, %c0_15] : memref<4x2x32xf32, #tpu.memory_space<vmem>>, vector<1x1x16xf32>
    %11 = vector.shape_cast %10 : vector<1x1x16xf32> to vector<1x16xf32>
    %c1_16 = arith.constant 1 : index
    %c1_17 = arith.constant 1 : index
    %c0_18 = arith.constant 0 : index
    %12 = vector.load %arg2[%c1_16, %c1_17, %c0_18] : memref<4x2x32xf32, #tpu.memory_space<vmem>>, vector<1x1x16xf32>
    %13 = vector.shape_cast %12 : vector<1x1x16xf32> to vector<1x16xf32>
    %c2 = arith.constant 2 : index
    %c0_19 = arith.constant 0 : index
    %c0_20 = arith.constant 0 : index
    %14 = vector.load %arg1[%c2, %c0_19, %c0_20] : memref<4x72x32xf32, #tpu.memory_space<vmem>>, vector<1x48x24xf32>
    %15 = vector.shape_cast %14 : vector<1x48x24xf32> to vector<48x24xf32>
    %c2_21 = arith.constant 2 : index
    %c0_22 = arith.constant 0 : index
    %c0_23 = arith.constant 0 : index
    %16 = vector.load %arg2[%c2_21, %c0_22, %c0_23] : memref<4x2x32xf32, #tpu.memory_space<vmem>>, vector<1x1x24xf32>
    %17 = vector.shape_cast %16 : vector<1x1x24xf32> to vector<1x24xf32>
    %c2_24 = arith.constant 2 : index
    %c1_25 = arith.constant 1 : index
    %c0_26 = arith.constant 0 : index
    %18 = vector.load %arg2[%c2_24, %c1_25, %c0_26] : memref<4x2x32xf32, #tpu.memory_space<vmem>>, vector<1x1x24xf32>
    %19 = vector.shape_cast %18 : vector<1x1x24xf32> to vector<1x24xf32>
    %c3 = arith.constant 3 : index
    %c0_27 = arith.constant 0 : index
    %c0_28 = arith.constant 0 : index
    %20 = vector.load %arg1[%c3, %c0_27, %c0_28] : memref<4x72x32xf32, #tpu.memory_space<vmem>>, vector<1x72x32xf32>
    %21 = vector.shape_cast %20 : vector<1x72x32xf32> to vector<72x32xf32>
    %c3_29 = arith.constant 3 : index
    %c0_30 = arith.constant 0 : index
    %c0_31 = arith.constant 0 : index
    %22 = vector.load %arg2[%c3_29, %c0_30, %c0_31] : memref<4x2x32xf32, #tpu.memory_space<vmem>>, vector<1x1x32xf32>
    %23 = vector.shape_cast %22 : vector<1x1x32xf32> to vector<1x32xf32>
    %c3_32 = arith.constant 3 : index
    %c1_33 = arith.constant 1 : index
    %c0_34 = arith.constant 0 : index
    %24 = vector.load %arg2[%c3_32, %c1_33, %c0_34] : memref<4x2x32xf32, #tpu.memory_space<vmem>>, vector<1x1x32xf32>
    %25 = vector.shape_cast %24 : vector<1x1x32xf32> to vector<1x32xf32>
    %c0_35 = arith.constant 0 : index
    %c0_36 = arith.constant 0 : index
    %26 = vector.load %arg3[%c0_35, %c0_36] : memref<385x16xf32, #tpu.memory_space<vmem>>, vector<384x16xf32>
    %c384 = arith.constant 384 : index
    %c0_37 = arith.constant 0 : index
    %27 = vector.load %arg3[%c384, %c0_37] : memref<385x16xf32, #tpu.memory_space<vmem>>, vector<1x16xf32>
    %c0_38 = arith.constant 0 : index
    %c0_39 = arith.constant 0 : index
    %c0_40 = arith.constant 0 : index
    %28 = vector.load %arg0[%c0_38, %c0_39, %c0_40] : memref<2x16x4xf32, #tpu.memory_space<vmem>>, vector<1x16x4xf32>
    %29 = vector.shape_cast %28 : vector<1x16x4xf32> to vector<16x4xf32>
    %30 = vector.extract_strided_slice %29 {offsets = [0, 0], sizes = [14, 4], strides = [1, 1]} : vector<16x4xf32> to vector<14x4xf32>
    %31 = vector.extract_strided_slice %29 {offsets = [1, 0], sizes = [14, 4], strides = [1, 1]} : vector<16x4xf32> to vector<14x4xf32>
    %32 = vector.extract_strided_slice %29 {offsets = [2, 0], sizes = [14, 4], strides = [1, 1]} : vector<16x4xf32> to vector<14x4xf32>
    %33 = tpu.concatenate %30, %31, %32 in 1 : vector<14x4xf32>, vector<14x4xf32>, vector<14x4xf32> -> vector<14x12xf32>
    %cst_41 = arith.constant dense<0.000000e+00> : vector<14x8xf32>
    %34 = tpu.matmul %33, %3, %cst_41 {dimension_numbers = #tpu.dot_dimension_numbers<[1], [0], [0], [1], [0, 0, 1, 1], [], []>} : vector<14x12xf32>, vector<12x8xf32>, vector<14x8xf32> -> vector<14x8xf32>
    %35 = vector.broadcast %5 : vector<1x8xf32> to vector<14x8xf32>
    %36 = arith.mulf %34, %35 : vector<14x8xf32>
    %37 = vector.broadcast %7 : vector<1x8xf32> to vector<14x8xf32>
    %38 = arith.addf %36, %37 : vector<14x8xf32>
    %cst_42 = arith.constant 0.000000e+00 : f32
    %39 = vector.broadcast %cst_42 : f32 to vector<14x8xf32>
    %40 = arith.maximumf %38, %39 : vector<14x8xf32>
    %c0_43 = arith.constant 0 : index
    %c2_44 = arith.constant 2 : index
    %c0_45 = arith.constant 0 : index
    %41 = vector.load %arg5[%c0_43, %c2_44, %c0_45] : memref<2x16x32xf32, #tpu.memory_space<vmem>>, vector<1x14x8xf32>
    %42 = vector.shape_cast %41 : vector<1x14x8xf32> to vector<14x8xf32>
    %43 = vector.shape_cast %40 : vector<14x8xf32> to vector<1x14x8xf32>
    tpu.vector_store %arg5[%c0_43, %c2_44, %c0_45], %43 {strides = array<i32>} : memref<2x16x32xf32, #tpu.memory_space<vmem>>, vector<1x14x8xf32>,
    %c0_46 = arith.constant 0 : index
    %c0_47 = arith.constant 0 : index
    %c0_48 = arith.constant 0 : index
    %44 = vector.load %arg5[%c0_46, %c0_47, %c0_48] : memref<2x16x32xf32, #tpu.memory_space<vmem>>, vector<1x16x8xf32>
    %45 = vector.shape_cast %44 : vector<1x16x8xf32> to vector<16x8xf32>
    %46 = vector.extract_strided_slice %45 {offsets = [0, 0], sizes = [14, 8], strides = [1, 1]} : vector<16x8xf32> to vector<14x8xf32>
    %47 = vector.extract_strided_slice %45 {offsets = [1, 0], sizes = [14, 8], strides = [1, 1]} : vector<16x8xf32> to vector<14x8xf32>
    %48 = vector.extract_strided_slice %45 {offsets = [2, 0], sizes = [14, 8], strides = [1, 1]} : vector<16x8xf32> to vector<14x8xf32>
    %49 = tpu.concatenate %46, %47, %48 in 1 : vector<14x8xf32>, vector<14x8xf32>, vector<14x8xf32> -> vector<14x24xf32>
    %cst_49 = arith.constant dense<0.000000e+00> : vector<14x16xf32>
    %50 = tpu.matmul %49, %9, %cst_49 {dimension_numbers = #tpu.dot_dimension_numbers<[1], [0], [0], [1], [0, 0, 1, 1], [], []>} : vector<14x24xf32>, vector<24x16xf32>, vector<14x16xf32> -> vector<14x16xf32>
    %51 = vector.broadcast %11 : vector<1x16xf32> to vector<14x16xf32>
    %52 = arith.mulf %50, %51 : vector<14x16xf32>
    %53 = vector.broadcast %13 : vector<1x16xf32> to vector<14x16xf32>
    %54 = arith.addf %52, %53 : vector<14x16xf32>
    %cst_50 = arith.constant 0.000000e+00 : f32
    %55 = vector.broadcast %cst_50 : f32 to vector<14x16xf32>
    %56 = arith.maximumf %54, %55 : vector<14x16xf32>
    %57 = vector.extract_strided_slice %56 {offsets = [0, 0], sizes = [12, 16], strides = [1, 1]} : vector<14x16xf32> to vector<12x16xf32>
    %58 = vector.extract_strided_slice %56 {offsets = [1, 0], sizes = [12, 16], strides = [1, 1]} : vector<14x16xf32> to vector<12x16xf32>
    %59 = vector.extract_strided_slice %56 {offsets = [2, 0], sizes = [12, 16], strides = [1, 1]} : vector<14x16xf32> to vector<12x16xf32>
    %60 = tpu.concatenate %57, %58, %59 in 1 : vector<12x16xf32>, vector<12x16xf32>, vector<12x16xf32> -> vector<12x48xf32>
    %cst_51 = arith.constant dense<0.000000e+00> : vector<12x24xf32>
    %61 = tpu.matmul %60, %15, %cst_51 {dimension_numbers = #tpu.dot_dimension_numbers<[1], [0], [0], [1], [0, 0, 1, 1], [], []>} : vector<12x48xf32>, vector<48x24xf32>, vector<12x24xf32> -> vector<12x24xf32>
    %62 = vector.broadcast %17 : vector<1x24xf32> to vector<12x24xf32>
    %63 = arith.mulf %61, %62 : vector<12x24xf32>
    %64 = vector.broadcast %19 : vector<1x24xf32> to vector<12x24xf32>
    %65 = arith.addf %63, %64 : vector<12x24xf32>
    %cst_52 = arith.constant 0.000000e+00 : f32
    %66 = vector.broadcast %cst_52 : f32 to vector<12x24xf32>
    %67 = arith.maximumf %65, %66 : vector<12x24xf32>
    %c0_53 = arith.constant 0 : index
    %c2_54 = arith.constant 2 : index
    %c0_55 = arith.constant 0 : index
    %68 = vector.load %arg5[%c0_53, %c2_54, %c0_55] : memref<2x16x32xf32, #tpu.memory_space<vmem>>, vector<1x12x24xf32>
    %69 = vector.shape_cast %68 : vector<1x12x24xf32> to vector<12x24xf32>
    %70 = vector.shape_cast %67 : vector<12x24xf32> to vector<1x12x24xf32>
    tpu.vector_store %arg5[%c0_53, %c2_54, %c0_55], %70 {strides = array<i32>} : memref<2x16x32xf32, #tpu.memory_space<vmem>>, vector<1x12x24xf32>,
    %c0_56 = arith.constant 0 : index
    %c0_57 = arith.constant 0 : index
    %c0_58 = arith.constant 0 : index
    %71 = vector.load %arg5[%c0_56, %c0_57, %c0_58] : memref<2x16x32xf32, #tpu.memory_space<vmem>>, vector<1x14x24xf32>
    %72 = vector.shape_cast %71 : vector<1x14x24xf32> to vector<14x24xf32>
    %73 = vector.extract_strided_slice %72 {offsets = [0, 0], sizes = [12, 24], strides = [1, 1]} : vector<14x24xf32> to vector<12x24xf32>
    %74 = vector.extract_strided_slice %72 {offsets = [1, 0], sizes = [12, 24], strides = [1, 1]} : vector<14x24xf32> to vector<12x24xf32>
    %75 = vector.extract_strided_slice %72 {offsets = [2, 0], sizes = [12, 24], strides = [1, 1]} : vector<14x24xf32> to vector<12x24xf32>
    %76 = tpu.concatenate %73, %74, %75 in 1 : vector<12x24xf32>, vector<12x24xf32>, vector<12x24xf32> -> vector<12x72xf32>
    %cst_59 = arith.constant dense<0.000000e+00> : vector<12x32xf32>
    %77 = tpu.matmul %76, %21, %cst_59 {dimension_numbers = #tpu.dot_dimension_numbers<[1], [0], [0], [1], [0, 0, 1, 1], [], []>} : vector<12x72xf32>, vector<72x32xf32>, vector<12x32xf32> -> vector<12x32xf32>
    %78 = vector.broadcast %23 : vector<1x32xf32> to vector<12x32xf32>
    %79 = arith.mulf %77, %78 : vector<12x32xf32>
    %80 = vector.broadcast %25 : vector<1x32xf32> to vector<12x32xf32>
    %81 = arith.addf %79, %80 : vector<12x32xf32>
    %cst_60 = arith.constant 0.000000e+00 : f32
    %82 = vector.broadcast %cst_60 : f32 to vector<12x32xf32>
    %83 = arith.maximumf %81, %82 : vector<12x32xf32>
    %84 = vector.extract_strided_slice %83 {offsets = [0, 0], sizes = [1, 32], strides = [1, 1]} : vector<12x32xf32> to vector<1x32xf32>
    %85 = vector.extract_strided_slice %83 {offsets = [1, 0], sizes = [1, 32], strides = [1, 1]} : vector<12x32xf32> to vector<1x32xf32>
    %86 = vector.extract_strided_slice %83 {offsets = [2, 0], sizes = [1, 32], strides = [1, 1]} : vector<12x32xf32> to vector<1x32xf32>
    %87 = vector.extract_strided_slice %83 {offsets = [3, 0], sizes = [1, 32], strides = [1, 1]} : vector<12x32xf32> to vector<1x32xf32>
    %88 = vector.extract_strided_slice %83 {offsets = [4, 0], sizes = [1, 32], strides = [1, 1]} : vector<12x32xf32> to vector<1x32xf32>
    %89 = vector.extract_strided_slice %83 {offsets = [5, 0], sizes = [1, 32], strides = [1, 1]} : vector<12x32xf32> to vector<1x32xf32>
    %90 = vector.extract_strided_slice %83 {offsets = [6, 0], sizes = [1, 32], strides = [1, 1]} : vector<12x32xf32> to vector<1x32xf32>
    %91 = vector.extract_strided_slice %83 {offsets = [7, 0], sizes = [1, 32], strides = [1, 1]} : vector<12x32xf32> to vector<1x32xf32>
    %92 = vector.extract_strided_slice %83 {offsets = [8, 0], sizes = [1, 32], strides = [1, 1]} : vector<12x32xf32> to vector<1x32xf32>
    %93 = vector.extract_strided_slice %83 {offsets = [9, 0], sizes = [1, 32], strides = [1, 1]} : vector<12x32xf32> to vector<1x32xf32>
    %94 = vector.extract_strided_slice %83 {offsets = [10, 0], sizes = [1, 32], strides = [1, 1]} : vector<12x32xf32> to vector<1x32xf32>
    %95 = vector.extract_strided_slice %83 {offsets = [11, 0], sizes = [1, 32], strides = [1, 1]} : vector<12x32xf32> to vector<1x32xf32>
    %96 = tpu.concatenate %84, %85, %86, %87, %88, %89, %90, %91, %92, %93, %94, %95 in 1 : vector<1x32xf32>, vector<1x32xf32>, vector<1x32xf32>, vector<1x32xf32>, vector<1x32xf32>, vector<1x32xf32>, vector<1x32xf32>, vector<1x32xf32>, vector<1x32xf32>, vector<1x32xf32>, vector<1x32xf32>, vector<1x32xf32> -> vector<1x384xf32>
    %c1_61 = arith.constant 1 : index
    %c0_62 = arith.constant 0 : index
    %c0_63 = arith.constant 0 : index
    %97 = vector.load %arg0[%c1_61, %c0_62, %c0_63] : memref<2x16x4xf32, #tpu.memory_space<vmem>>, vector<1x16x4xf32>
    %98 = vector.shape_cast %97 : vector<1x16x4xf32> to vector<16x4xf32>
    %99 = vector.extract_strided_slice %98 {offsets = [0, 0], sizes = [14, 4], strides = [1, 1]} : vector<16x4xf32> to vector<14x4xf32>
    %100 = vector.extract_strided_slice %98 {offsets = [1, 0], sizes = [14, 4], strides = [1, 1]} : vector<16x4xf32> to vector<14x4xf32>
    %101 = vector.extract_strided_slice %98 {offsets = [2, 0], sizes = [14, 4], strides = [1, 1]} : vector<16x4xf32> to vector<14x4xf32>
    %102 = tpu.concatenate %99, %100, %101 in 1 : vector<14x4xf32>, vector<14x4xf32>, vector<14x4xf32> -> vector<14x12xf32>
    %cst_64 = arith.constant dense<0.000000e+00> : vector<14x8xf32>
    %103 = tpu.matmul %102, %3, %cst_64 {dimension_numbers = #tpu.dot_dimension_numbers<[1], [0], [0], [1], [0, 0, 1, 1], [], []>} : vector<14x12xf32>, vector<12x8xf32>, vector<14x8xf32> -> vector<14x8xf32>
    %104 = vector.broadcast %5 : vector<1x8xf32> to vector<14x8xf32>
    %105 = arith.mulf %103, %104 : vector<14x8xf32>
    %106 = vector.broadcast %7 : vector<1x8xf32> to vector<14x8xf32>
    %107 = arith.addf %105, %106 : vector<14x8xf32>
    %cst_65 = arith.constant 0.000000e+00 : f32
    %108 = vector.broadcast %cst_65 : f32 to vector<14x8xf32>
    %109 = arith.maximumf %107, %108 : vector<14x8xf32>
    %c1_66 = arith.constant 1 : index
    %c2_67 = arith.constant 2 : index
    %c0_68 = arith.constant 0 : index
    %110 = vector.load %arg5[%c1_66, %c2_67, %c0_68] : memref<2x16x32xf32, #tpu.memory_space<vmem>>, vector<1x14x8xf32>
    %111 = vector.shape_cast %110 : vector<1x14x8xf32> to vector<14x8xf32>
    %112 = vector.shape_cast %109 : vector<14x8xf32> to vector<1x14x8xf32>
    tpu.vector_store %arg5[%c1_66, %c2_67, %c0_68], %112 {strides = array<i32>} : memref<2x16x32xf32, #tpu.memory_space<vmem>>, vector<1x14x8xf32>,
    %c1_69 = arith.constant 1 : index
    %c0_70 = arith.constant 0 : index
    %c0_71 = arith.constant 0 : index
    %113 = vector.load %arg5[%c1_69, %c0_70, %c0_71] : memref<2x16x32xf32, #tpu.memory_space<vmem>>, vector<1x16x8xf32>
    %114 = vector.shape_cast %113 : vector<1x16x8xf32> to vector<16x8xf32>
    %115 = vector.extract_strided_slice %114 {offsets = [0, 0], sizes = [14, 8], strides = [1, 1]} : vector<16x8xf32> to vector<14x8xf32>
    %116 = vector.extract_strided_slice %114 {offsets = [1, 0], sizes = [14, 8], strides = [1, 1]} : vector<16x8xf32> to vector<14x8xf32>
    %117 = vector.extract_strided_slice %114 {offsets = [2, 0], sizes = [14, 8], strides = [1, 1]} : vector<16x8xf32> to vector<14x8xf32>
    %118 = tpu.concatenate %115, %116, %117 in 1 : vector<14x8xf32>, vector<14x8xf32>, vector<14x8xf32> -> vector<14x24xf32>
    %cst_72 = arith.constant dense<0.000000e+00> : vector<14x16xf32>
    %119 = tpu.matmul %118, %9, %cst_72 {dimension_numbers = #tpu.dot_dimension_numbers<[1], [0], [0], [1], [0, 0, 1, 1], [], []>} : vector<14x24xf32>, vector<24x16xf32>, vector<14x16xf32> -> vector<14x16xf32>
    %120 = vector.broadcast %11 : vector<1x16xf32> to vector<14x16xf32>
    %121 = arith.mulf %119, %120 : vector<14x16xf32>
    %122 = vector.broadcast %13 : vector<1x16xf32> to vector<14x16xf32>
    %123 = arith.addf %121, %122 : vector<14x16xf32>
    %cst_73 = arith.constant 0.000000e+00 : f32
    %124 = vector.broadcast %cst_73 : f32 to vector<14x16xf32>
    %125 = arith.maximumf %123, %124 : vector<14x16xf32>
    %126 = vector.extract_strided_slice %125 {offsets = [0, 0], sizes = [12, 16], strides = [1, 1]} : vector<14x16xf32> to vector<12x16xf32>
    %127 = vector.extract_strided_slice %125 {offsets = [1, 0], sizes = [12, 16], strides = [1, 1]} : vector<14x16xf32> to vector<12x16xf32>
    %128 = vector.extract_strided_slice %125 {offsets = [2, 0], sizes = [12, 16], strides = [1, 1]} : vector<14x16xf32> to vector<12x16xf32>
    %129 = tpu.concatenate %126, %127, %128 in 1 : vector<12x16xf32>, vector<12x16xf32>, vector<12x16xf32> -> vector<12x48xf32>
    %cst_74 = arith.constant dense<0.000000e+00> : vector<12x24xf32>
    %130 = tpu.matmul %129, %15, %cst_74 {dimension_numbers = #tpu.dot_dimension_numbers<[1], [0], [0], [1], [0, 0, 1, 1], [], []>} : vector<12x48xf32>, vector<48x24xf32>, vector<12x24xf32> -> vector<12x24xf32>
    %131 = vector.broadcast %17 : vector<1x24xf32> to vector<12x24xf32>
    %132 = arith.mulf %130, %131 : vector<12x24xf32>
    %133 = vector.broadcast %19 : vector<1x24xf32> to vector<12x24xf32>
    %134 = arith.addf %132, %133 : vector<12x24xf32>
    %cst_75 = arith.constant 0.000000e+00 : f32
    %135 = vector.broadcast %cst_75 : f32 to vector<12x24xf32>
    %136 = arith.maximumf %134, %135 : vector<12x24xf32>
    %c1_76 = arith.constant 1 : index
    %c2_77 = arith.constant 2 : index
    %c0_78 = arith.constant 0 : index
    %137 = vector.load %arg5[%c1_76, %c2_77, %c0_78] : memref<2x16x32xf32, #tpu.memory_space<vmem>>, vector<1x12x24xf32>
    %138 = vector.shape_cast %137 : vector<1x12x24xf32> to vector<12x24xf32>
    %139 = vector.shape_cast %136 : vector<12x24xf32> to vector<1x12x24xf32>
    tpu.vector_store %arg5[%c1_76, %c2_77, %c0_78], %139 {strides = array<i32>} : memref<2x16x32xf32, #tpu.memory_space<vmem>>, vector<1x12x24xf32>,
    %c1_79 = arith.constant 1 : index
    %c0_80 = arith.constant 0 : index
    %c0_81 = arith.constant 0 : index
    %140 = vector.load %arg5[%c1_79, %c0_80, %c0_81] : memref<2x16x32xf32, #tpu.memory_space<vmem>>, vector<1x14x24xf32>
    %141 = vector.shape_cast %140 : vector<1x14x24xf32> to vector<14x24xf32>
    %142 = vector.extract_strided_slice %141 {offsets = [0, 0], sizes = [12, 24], strides = [1, 1]} : vector<14x24xf32> to vector<12x24xf32>
    %143 = vector.extract_strided_slice %141 {offsets = [1, 0], sizes = [12, 24], strides = [1, 1]} : vector<14x24xf32> to vector<12x24xf32>
    %144 = vector.extract_strided_slice %141 {offsets = [2, 0], sizes = [12, 24], strides = [1, 1]} : vector<14x24xf32> to vector<12x24xf32>
    %145 = tpu.concatenate %142, %143, %144 in 1 : vector<12x24xf32>, vector<12x24xf32>, vector<12x24xf32> -> vector<12x72xf32>
    %cst_82 = arith.constant dense<0.000000e+00> : vector<12x32xf32>
    %146 = tpu.matmul %145, %21, %cst_82 {dimension_numbers = #tpu.dot_dimension_numbers<[1], [0], [0], [1], [0, 0, 1, 1], [], []>} : vector<12x72xf32>, vector<72x32xf32>, vector<12x32xf32> -> vector<12x32xf32>
    %147 = vector.broadcast %23 : vector<1x32xf32> to vector<12x32xf32>
    %148 = arith.mulf %146, %147 : vector<12x32xf32>
    %149 = vector.broadcast %25 : vector<1x32xf32> to vector<12x32xf32>
    %150 = arith.addf %148, %149 : vector<12x32xf32>
    %cst_83 = arith.constant 0.000000e+00 : f32
    %151 = vector.broadcast %cst_83 : f32 to vector<12x32xf32>
    %152 = arith.maximumf %150, %151 : vector<12x32xf32>
    %153 = vector.extract_strided_slice %152 {offsets = [0, 0], sizes = [1, 32], strides = [1, 1]} : vector<12x32xf32> to vector<1x32xf32>
    %154 = vector.extract_strided_slice %152 {offsets = [1, 0], sizes = [1, 32], strides = [1, 1]} : vector<12x32xf32> to vector<1x32xf32>
    %155 = vector.extract_strided_slice %152 {offsets = [2, 0], sizes = [1, 32], strides = [1, 1]} : vector<12x32xf32> to vector<1x32xf32>
    %156 = vector.extract_strided_slice %152 {offsets = [3, 0], sizes = [1, 32], strides = [1, 1]} : vector<12x32xf32> to vector<1x32xf32>
    %157 = vector.extract_strided_slice %152 {offsets = [4, 0], sizes = [1, 32], strides = [1, 1]} : vector<12x32xf32> to vector<1x32xf32>
    %158 = vector.extract_strided_slice %152 {offsets = [5, 0], sizes = [1, 32], strides = [1, 1]} : vector<12x32xf32> to vector<1x32xf32>
    %159 = vector.extract_strided_slice %152 {offsets = [6, 0], sizes = [1, 32], strides = [1, 1]} : vector<12x32xf32> to vector<1x32xf32>
    %160 = vector.extract_strided_slice %152 {offsets = [7, 0], sizes = [1, 32], strides = [1, 1]} : vector<12x32xf32> to vector<1x32xf32>
    %161 = vector.extract_strided_slice %152 {offsets = [8, 0], sizes = [1, 32], strides = [1, 1]} : vector<12x32xf32> to vector<1x32xf32>
    %162 = vector.extract_strided_slice %152 {offsets = [9, 0], sizes = [1, 32], strides = [1, 1]} : vector<12x32xf32> to vector<1x32xf32>
    %163 = vector.extract_strided_slice %152 {offsets = [10, 0], sizes = [1, 32], strides = [1, 1]} : vector<12x32xf32> to vector<1x32xf32>
    %164 = vector.extract_strided_slice %152 {offsets = [11, 0], sizes = [1, 32], strides = [1, 1]} : vector<12x32xf32> to vector<1x32xf32>
    %165 = tpu.concatenate %153, %154, %155, %156, %157, %158, %159, %160, %161, %162, %163, %164 in 1 : vector<1x32xf32>, vector<1x32xf32>, vector<1x32xf32>, vector<1x32xf32>, vector<1x32xf32>, vector<1x32xf32>, vector<1x32xf32>, vector<1x32xf32>, vector<1x32xf32>, vector<1x32xf32>, vector<1x32xf32>, vector<1x32xf32> -> vector<1x384xf32>
    %166 = tpu.concatenate %96, %165 in 0 : vector<1x384xf32>, vector<1x384xf32> -> vector<2x384xf32>
    %cst_84 = arith.constant dense<0.000000e+00> : vector<2x16xf32>
    %167 = tpu.matmul %166, %26, %cst_84 {dimension_numbers = #tpu.dot_dimension_numbers<[1], [0], [0], [1], [0, 0, 1, 1], [], []>} : vector<2x384xf32>, vector<384x16xf32>, vector<2x16xf32> -> vector<2x16xf32>
    %168 = vector.broadcast %27 : vector<1x16xf32> to vector<2x16xf32>
    %169 = arith.addf %167, %168 : vector<2x16xf32>
    %170 = arith.mulf %169, %169 : vector<2x16xf32>
    %cst_85 = arith.constant dense<0.000000e+00> : vector<2xf32>
    %171 = vector.multi_reduction <add>, %170, %cst_85 [1] : vector<2x16xf32> to vector<2xf32>
    %172 = vector.shape_cast %171 : vector<2xf32> to vector<2x1xf32>
    %cst_86 = arith.constant 1.000000e-24 : f32
    %173 = vector.broadcast %cst_86 : f32 to vector<2x1xf32>
    %174 = arith.maximumf %172, %173 : vector<2x1xf32>
    %175 = math.rsqrt %174 : vector<2x1xf32>
    %176 = vector.broadcast %175 : vector<2x1xf32> to vector<2x16xf32>
    %177 = arith.mulf %169, %176 : vector<2x16xf32>
    %c0_87 = arith.constant 0 : index
    %c0_88 = arith.constant 0 : index
    %178 = vector.load %arg4[%c0_87, %c0_88] : memref<2x16xf32, #tpu.memory_space<vmem>>, vector<2x16xf32>
    tpu.vector_store %arg4[%c0_87, %c0_88], %177 {strides = array<i32>} : memref<2x16xf32, #tpu.memory_space<vmem>>, vector<2x16xf32>,
    return
  }
}

</mosaic_0001>

<bundles_post_ra>
// kernel: tpu_custom_call.1
= control target key start
LH: loop header
LB: loop body
LE: loop exit
PB: predicated region body
PF: predicated region fallthrough
CT: control target
= control target key end

     0   :  { %vm110_vm0 = vcmask 1046528   ;;  %vm120_vm1 = vcmask 1045504   ;;  %vm143_vm2 = vcmask 1043456   ;;  %vm1854_vm3 = vmmov 1   ;;  %s1855_s23 = smov 4   ;;  %s1856_s24 = smov 8   ;;  %s2453_s0 = inlined_call_operand.vmem [shape: f32[2,16,4], index: 0, kind: input, shape index: {}]   ;;  %s2454_s1 = inlined_call_operand.vmem [shape: f32[4,72,32], index: 1, kind: input, shape index: {}]   ;;  %s2455_s2 = inlined_call_operand.vmem [shape: f32[4,2,32], index: 2, kind: input, shape index: {}]   ;;  %s2456_s3 = inlined_call_operand.vmem [shape: f32[385,16], index: 3, kind: input, shape index: {}]   ;;  %s2457_s4 = inlined_call_operand.hbm [shape: f32[2,16], index: 4, kind: output, shape index: {}]  }
   0x1   :  { %v106_v0 = vld [vmem:[%s2453_s0] sm:$0xff]  ;;  %v107_v1 = vld [vmem:[%s2453_s0 + $0x8] sm:$0xff]  ;;  %vm1908_vm4 = vmpackc.low %vm143_vm2, %vm1854_vm3  ;;  %vm18_vm5 = vcmask 261120  }
   0x2   :  { %v111_v2 = vrot.slane %v106_v0, 1  ;;  %v112_v3 = vrot.slane %v107_v1, 1  ;;  %v121_v4 = vrot.slane %v106_v0, 2  ;;  %v122_v5 = vrot.slane %v107_v1, 2  ;;  %v23_v6 = vld [vmem:[%s2454_s1] sm:$0xff] }
   0x3   :  { %v24_v7 = vld [vmem:[%s2454_s1 + $0x8] sm:$0xf] }
   0x4   :  { %v113_v8 = vsel %vm110_vm0, %v111_v2, %v112_v3  ;;  %v123_v9 = vsel %vm120_vm1, %v121_v4, %v122_v5  ;;  %v1906_v10 = vpack.c.bf16 %v24_v7, %v23_v6 }
   0x5   :  { %114 = vrot.lane.b32.xlu0 %v113_v8, %s1855_s23  ;;  %124 = vrot.lane.b32.xlu1 %v123_v9, %s1856_s24 }
   0x6   :  { %9 = vsyncpa [#allocation4], 0  ;;  %1645 = vmatprep.subr.msk.bf16.mxu1 %vm1908_vm4, %v1906_v10  ;;  %v1857_v12 = vmov 0.0   ;;  %vm130_vm6 = vcmask 31744   ;;  %vm133_vm7 = vcmask 64512   ;;  %vm136_vm8 = vcmask 97280  }
   0x7   :  { %20 = vst.msk [vmem:[#allocation2 + $0x8] sm:$0xff] %vm18_vm5, %v1857_v12  ;;  %19 = vst.msk [vmem:[#allocation2] sm:$0xff] %vm18_vm5, %v1857_v12  ;;  %1648 = vmatpush3.bf16.msk.msra.mxu1 %vm1908_vm4, %v1906_v10  ;;  %v1939_v21 = vld [vmem:[%s2455_s2] ss:$0 sm:$0xff]  ;;  %v1944_v22 = vld [vmem:[%s2455_s2 + $0x1] ss:$0 sm:$0xff] }
   0x8   :  { %21 = vst.msk [vmem:[#allocation2 + $0x10] sm:$0xff] %vm18_vm5, %v1857_v12  ;;  %22 = vst.msk [vmem:[#allocation2 + $0x18] sm:$0xff] %vm18_vm5, %v1857_v12  ;;  %v1343_v28 = vld [vmem:[%s2454_s1 + $0x48] sm:$0xff]  ;;  %v1344_v29 = vld [vmem:[%s2454_s1 + $0x50] sm:$0xff]  ;;  %vm237_vm9 = vcmask 62464   ;;  %s1858_s9 = smov 16  }
   0x9   :  { %116 = vrot.lane.b32.xlu0 %v112_v3, %s1855_s23  ;;  %126 = vrot.lane.b32.xlu1 %v122_v5, %s1856_s24  ;;  %v1956_v31 = vpack.c.bf16 %v1344_v29, %v1343_v28  ;;  %v1965_v34 = vld [vmem:[%s2454_s1 + $0x58] sm:$0xff]  ;;  %vm263_vm10 = vcmask 130048   ;;  %vm266_vm11 = vcmask 195584   ;;  %v1384_v53 = vld [vmem:[%s2453_s0 + $0x10] sm:$0xff]  ;;  %s1859_s30 = smov 32   ;;  %vm386_vm12 = vcmask 392192  }
   0xa   :  { %v1984_v51 = vld [vmem:[%s2453_s0 + $0x18] sm:$0xff]  ;;  %v663_v54 = vrot.slane %v1384_v53, 1  ;;  %v1348_v56 = vld [vmem:[%s2454_s1 + $0x90] sm:$0xff]  ;;  %v1350_v58 = vld [vmem:[%s2454_s1 + $0xa0] sm:$0xff]  ;;  %vm483_vm13 = vcmask 191488   ;;  %vm511_vm14 = vcmask 588800  }
   0xb   :  { %1650 = vmatprep.subr.bf16.mxu1 %v1956_v31  ;;  %v664_v52 = vrot.slane %v1984_v51, 1  ;;  %v1349_v57 = vld [vmem:[%s2454_s1 + $0x98] sm:$0xff]  ;;  %v1351_v60 = vld [vmem:[%s2454_s1 + $0xa8] sm:$0xff]  ;;  %v1352_v62 = vld [vmem:[%s2454_s1 + $0xb0] sm:$0xff]  ;;  %s1863_s6 = smov 64   ;;  %vm1865_vm15 = vmmov 0  }
   0xc   :  { %v2002_v59 = vpack.c.bf16 %v1349_v57, %v1348_v56  ;;  %v2007_v61 = vpack.c.bf16 %v1351_v60, %v1350_v58  ;;  %v1353_v63 = vld [vmem:[%s2454_s1 + $0xb8] sm:$0xff]  ;;  %v2029_v2 = vld [vmem:[%s2455_s2 + $0x3] ss:$0 sm:$0xff]  ;;  %v1358_v57 = vld [vmem:[%s2454_s1 + $0xe8] sm:$0xff]  ;;  %vm1172_vm2 = vcmask 1040384   ;;  %vm1321_vm3 = vcmask 123904  }
   0xd   :  { %v665_v55 = vsel %vm110_vm0, %v663_v54, %v664_v52  ;;  %v1357_v11 = vld [vmem:[%s2454_s1 + $0xe0] sm:$0xff]  ;;  %v1359_v58 = vld [vmem:[%s2454_s1 + $0xf0] sm:$0xff] }
   0xe   :  { %1654 = vmatprep.subr.bf16.mxu0 %v2002_v59 }
   0xf   :  { %1656 = vmatpush3.bf16.msra.mxu0 %v2002_v59 }
  0x10   :  { %1658 = vmatprep.subr.bf16.mxu0 %v2007_v61 }
  0x13   :  { %1660 = vmatpush3.bf16.msra.mxu0 %v2007_v61 }
  0x77   :  { %v115_v13 = vpop.permute.xlu0 %114  ;;  %v125_v14 = vpop.permute.xlu1 %124 }
  0x78   :  { %v131_v15 = vsel %vm130_vm6, %v106_v0, %v115_v13  ;;  %v2022_v0 = vld [vmem:[%s2455_s2 + $0x2] ss:$0 sm:$0xff] }
  0x79   :  { %v134_v16 = vsel %vm133_vm7, %v131_v15, %v125_v14 }
  0x7a   :  { %1508 = vmatprep.mubr.msk.f32.mxu1 %vm136_vm8, %v134_v16 }
  0x7b   :  { %v117_v17 = vpop.permute.xlu0 %116  ;;  %v127_v18 = vpop.permute.xlu1 %126 }
  0x7c   :  { %v132_v19 = vsel %vm130_vm6, %v107_v1, %v117_v17  ;;  %v2024_v1 = vpack.c.bf16 %v1353_v63, %v1352_v62  ;;  %v2107_v62 = vpack.c.bf16 %v1359_v58, %v1358_v57 }
  0x7d   :  { %v135_v20 = vsel %vm133_vm7, %v132_v19, %v127_v18  ;;  %v673_v19 = vrot.slane %v1984_v51, 2 }
  0x7e   :  { %1509 = vmatmul.mubr.msk.f32.vlgmr.msra.gmra.mrb[0].mxu1 %vm136_vm8, %v135_v20  ;;  %1662 = vmatprep.subr.bf16.mxu0 %v2024_v1  ;;  %v672_v20 = vrot.slane %v1384_v53, 2 }
  0x7f   :  { %1652 = vmatpush3.bf16.msra.mxu1 %v1956_v31  ;;  %1664 = vmatpush3.bf16.msra.mxu0 %v2024_v1 }
  0x80   :  { %1515 = vmatprep.subr.mxu1 %v1965_v34  ;;  %1683 = vmatprep.subr.msk.bf16.mxu0 %vm1908_vm4, %v1906_v10 }
  0x83   :  { %1516 = vmatpush3.msra.mxu1 %v1965_v34 }
 0x151   :  { %v1510_v23 = vpop.f32.mrb[0].mxu1 }
 0x152   :  { %v227_v24 = vmul.f32 %v1510_v23, %v1939_v21  ;;  %v213_v25 = vpop.f32.mrb[1].mxu1 }
 0x153   :  { %v226_v26 = vmul.f32 %v1939_v21, %v213_v25 }
 0x154   :  { %v233_v27 = vadd.f32 %v1944_v22, %v227_v24  ;;  %v674_v24 = vsel %vm120_vm1, %v672_v20, %v673_v19 }
 0x155   :  { %v232_v30 = vadd.f32 %v1944_v22, %v226_v26 }
 0x156   :  { %v235_v32 = vmax.f32 %v233_v27, 0.0 }
 0x157   :  { %v234_v33 = vmax.f32 %v232_v30, 0.0 }
 0x158   :  { %238 = vst.msk [vmem:[#allocation2 + $0xa] sm:$0x3f] %vm237_vm9, %v235_v32 }
 0x159   :  { %236 = vst.msk [vmem:[#allocation2 + $0x2] sm:$0xff] %vm133_vm7, %v234_v33 }
 0x160   :  { %v240_v35 = vld [vmem:[#allocation2 + $0x8] sm:$0xff]  ;;  %v239_v36 = vld [vmem:[#allocation2] sm:$0xff] }
 0x161   :  { %v244_v37 = vrot.slane %v240_v35, 1  ;;  %v243_v38 = vrot.slane %v239_v36, 1  ;;  %v253_v40 = vrot.slane %v240_v35, 2  ;;  %v252_v41 = vrot.slane %v239_v36, 2 }
 0x163   :  { %248 = vrot.lane.b32.xlu1 %v244_v37, %s1856_s24  ;;  %v245_v39 = vsel %vm110_vm0, %v243_v38, %v244_v37  ;;  %v254_v42 = vsel %vm120_vm1, %v252_v41, %v253_v40 }
 0x164   :  { %246 = vrot.lane.b32.xlu0 %v245_v39, %s1856_s24 }
 0x167   :  { %257 = vrot.lane.b32.xlu1 %v253_v40, %s1858_s9 }
 0x168   :  { %255 = vrot.lane.b32.xlu0 %v254_v42, %s1858_s9 }
 0x16b   :  { %668 = vrot.lane.b32.xlu1 %v664_v52, %s1855_s23 }
 0x16c   :  { %666 = vrot.lane.b32.xlu0 %v665_v55, %s1855_s23 }
 0x1d5   :  { %v249_v43 = vpop.permute.xlu1 %248 }
 0x1d6   :  { %v247_v44 = vpop.permute.xlu0 %246  ;;  %v262_v48 = vsel %vm133_vm7, %v240_v35, %v249_v43 }
 0x1d7   :  { %v261_v46 = vsel %vm133_vm7, %v239_v36, %v247_v44 }
 0x1d9   :  { %v258_v45 = vpop.permute.xlu1 %257 }
 0x1da   :  { %v256_v47 = vpop.permute.xlu0 %255  ;;  %v265_v50 = vsel %vm263_vm10, %v262_v48, %v258_v45 }
 0x1db   :  { %v264_v49 = vsel %vm263_vm10, %v261_v46, %v256_v47 }
 0x1dc   :  { %1517 = vmatprep.mubr.msk.f32.mxu1 %vm266_vm11, %v264_v49 }
 0x1dd   :  { %1518 = vmatmul.mubr.msk.f32.vlgmr.msra.gmra.mrb[2].mxu1 %vm266_vm11, %v265_v50  ;;  %v669_v25 = vpop.permute.xlu1 %668 }
 0x1de   :  { %v667_v26 = vpop.permute.xlu0 %666  ;;  %v682_v40 = vsel %vm130_vm6, %v1984_v51, %v669_v25 }
 0x1df   :  { %v681_v38 = vsel %vm130_vm6, %v1384_v53, %v667_v26 }
 0x2b0   :  { %v1519_v3 = vpop.f32.mrb[2].mxu1 }
 0x2b1   :  { %v353_v4 = vmul.f32 %v1519_v3, %v2022_v0  ;;  %v339_v5 = vpop.f32.mrb[3].mxu1  ;;  %v1360_v3 = vld [vmem:[%s2454_s1 + $0xf8] sm:$0xff] }
 0x2b2   :  { %v352_v6 = vmul.f32 %v2022_v0, %v339_v5  ;;  %v1362_v5 = vld [vmem:[%s2454_s1 + $0x108] sm:$0xff] }
 0x2b3   :  { %v359_v7 = vadd.f32 %v2029_v2, %v353_v4  ;;  %v1361_v4 = vld [vmem:[%s2454_s1 + $0x100] sm:$0xff] }
 0x2b4   :  { %v358_v8 = vadd.f32 %v2029_v2, %v352_v6  ;;  %v1363_v6 = vld [vmem:[%s2454_s1 + $0x110] sm:$0xff] }
 0x2b5   :  { %v361_v9 = vmax.f32 %v359_v7, 0.0  ;;  %v1677_v7 = vpack.c.bf16 %v1363_v6, %v1362_v5 }
 0x2b6   :  { %v360_v13 = vmax.f32 %v358_v8, 0.0 }
 0x2b7   :  { %v365_v14 = vrot.slane %v361_v9, 1  ;;  %v374_v17 = vrot.slane %v361_v9, 2 }
 0x2b8   :  { %v364_v15 = vrot.slane %v360_v13, 1  ;;  %v373_v18 = vrot.slane %v360_v13, 2 }
 0x2b9   :  { %369 = vrot.lane.b32.xlu1 %v365_v14, %s1858_s9 }
 0x2ba   :  { %v366_v16 = vsel %vm110_vm0, %v364_v15, %v365_v14  ;;  %v375_v23 = vsel %vm120_vm1, %v373_v18, %v374_v17  ;;  %v1364_v15 = vld [vmem:[%s2454_s1 + $0x118] sm:$0xff] }
 0x2bb   :  { %367 = vrot.lane.b32.xlu0 %v366_v16, %s1858_s9 }
 0x2bd   :  { %378 = vrot.lane.b32.xlu1 %v374_v17, %s1859_s30 }
 0x2bf   :  { %376 = vrot.lane.b32.xlu0 %v375_v23, %s1859_s30 }
 0x2c1   :  { %677 = vrot.lane.b32.xlu1 %v673_v19, %s1856_s24 }
 0x2c3   :  { %675 = vrot.lane.b32.xlu0 %v674_v24, %s1856_s24 }
 0x32b   :  { %v370_v27 = vpop.permute.xlu1 %369 }
 0x32c   :  { %v383_v33 = vsel %vm263_vm10, %v361_v9, %v370_v27 }
 0x32d   :  { %v368_v28 = vpop.permute.xlu0 %367 }
 0x32e   :  { %v382_v30 = vsel %vm263_vm10, %v360_v13, %v368_v28 }
 0x32f   :  { %v379_v29 = vpop.permute.xlu1 %378 }
 0x330   :  { %v385_v36 = vsel %vm18_vm5, %v383_v33, %v379_v29 }
 0x331   :  { %v377_v32 = vpop.permute.xlu0 %376 }
 0x332   :  { %v384_v35 = vsel %vm18_vm5, %v382_v30, %v377_v32 }
 0x333   :  { %1532 = vmatprep.mubr.msk.f32.mxu0 %vm386_vm12, %v384_v35  ;;  %v678_v37 = vpop.permute.xlu1 %677 }
 0x334   :  { %1533 = vmatmul.mubr.msk.f32.vlgmr.msra.gmra.mrb[0].mxu0 %vm386_vm12, %v385_v36  ;;  %v684_v42 = vsel %vm133_vm7, %v682_v40, %v678_v37 }
 0x335   :  { %1686 = vmatpush3.bf16.msk.msra.mxu0 %vm1908_vm4, %v1906_v10  ;;  %v676_v39 = vpop.permute.xlu0 %675  ;;  %v1356_v10 = vld [vmem:[%s2454_s1 + $0xd8] sm:$0xff]  ;;  %s1860_s1 = smov 24  }
 0x336   :  { %v683_v41 = vsel %vm133_vm7, %v681_v38, %v676_v39  ;;  %1688 = vmatprep.subr.bf16.mxu0 %v1956_v31  ;;  %v2076_v43 = vpack.c.bf16 %v1357_v11, %v1356_v10 }
 0x337   :  { %1560 = vmatprep.mubr.msk.f32.mxu0 %vm136_vm8, %v683_v41 }
 0x338   :  { %1561 = vmatmul.mubr.msk.f32.vlgmr.msra.gmra.mrb[2].mxu0 %vm136_vm8, %v684_v42  ;;  %1666 = vmatprep.subr.bf16.mxu1 %v2076_v43 }
 0x339   :  { %1690 = vmatpush3.bf16.msra.mxu0 %v1956_v31  ;;  %1668 = vmatpush3.bf16.msra.mxu1 %v2076_v43  ;;  %v2084_v31 = vld [vmem:[%s2455_s2 + $0x4] ss:$0 sm:$0xff] }
 0x33a   :  { %1567 = vmatprep.subr.mxu0 %v1965_v34  ;;  %1670 = vmatprep.subr.bf16.mxu1 %v2107_v62 }
 0x33d   :  { %1568 = vmatpush3.msra.mxu0 %v1965_v34  ;;  %v2089_v34 = vld [vmem:[%s2455_s2 + $0x5] ss:$0 sm:$0xff]  ;;  %1672 = vmatpush3.bf16.msra.mxu1 %v2107_v62 }
 0x33e   :  { %1704 = vmatprep.subr.bf16.mxu0 %v2076_v43 }
 0x407   :  { %v1534_v44 = vpop.f32.mrb[0].mxu0 }
 0x408   :  { %v473_v45 = vmul.f32 %v1534_v44, %v2084_v31  ;;  %v459_v46 = vpop.f32.mrb[1].mxu0 }
 0x409   :  { %v472_v47 = vmul.f32 %v2084_v31, %v459_v46 }
 0x40a   :  { %v479_v48 = vadd.f32 %v2089_v34, %v473_v45 }
 0x40b   :  { %v478_v49 = vadd.f32 %v2089_v34, %v472_v47  ;;  %v1562_v50 = vpop.f32.mrb[2].mxu0 }
 0x40c   :  { %v481_v51 = vmax.f32 %v479_v48, 0.0  ;;  %v767_v52 = vmul.f32 %v1562_v50, %v1939_v21  ;;  %v757_v53 = vpop.f32.mrb[3].mxu0 }
 0x40d   :  { %v480_v54 = vmax.f32 %v478_v49, 0.0  ;;  %v766_v55 = vmul.f32 %v1939_v21, %v757_v53 }
 0x40e   :  { %484 = vst.msk [vmem:[#allocation2 + $0xa] sm:$0xf] %vm483_vm13, %v481_v51  ;;  %v769_v56 = vadd.f32 %v1944_v22, %v767_v52 }
 0x40f   :  { %482 = vst.msk [vmem:[#allocation2 + $0x2] sm:$0xff] %vm266_vm11, %v480_v54  ;;  %v768_v60 = vadd.f32 %v1944_v22, %v766_v55  ;;  %v2119_v22 = vpack.c.bf16 %v1361_v4, %v1360_v3 }
 0x410   :  { %v771_v63 = vmax.f32 %v769_v56, 0.0 }
 0x411   :  { %v770_v21 = vmax.f32 %v768_v60, 0.0  ;;  %1674 = vmatprep.subr.bf16.mxu1 %v2119_v22 }
 0x412   :  { %774 = vst.msk [vmem:[#allocation2 + $0x1a] sm:$0x3f] %vm237_vm9, %v771_v63  ;;  %1676 = vmatpush3.bf16.msra.mxu1 %v2119_v22 }
 0x413   :  { %773 = vst.msk [vmem:[#allocation2 + $0x12] sm:$0xff] %vm133_vm7, %v770_v21  ;;  %1678 = vmatprep.subr.bf16.mxu1 %v1677_v7 }
 0x416   :  { %1680 = vmatpush3.bf16.msra.mxu1 %v1677_v7  ;;  %v486_v19 = vld [vmem:[#allocation2 + $0x8] sm:$0x3f]  ;;  %v485_v20 = vld [vmem:[#allocation2] sm:$0xff] }
 0x417   :  { %1551 = vmatprep.subr.mxu1 %v1364_v15  ;;  %v490_v24 = vrot.slane %v486_v19, 1  ;;  %v489_v25 = vrot.slane %v485_v20, 1  ;;  %v499_v27 = vrot.slane %v486_v19, 2  ;;  %v498_v28 = vrot.slane %v485_v20, 2 }
 0x419   :  { %v491_v26 = vsel %vm110_vm0, %v489_v25, %v490_v24  ;;  %v500_v29 = vsel %vm120_vm1, %v498_v28, %v499_v27 }
 0x41a   :  { %v776_v8 = vld [vmem:[#allocation2 + $0x18] sm:$0xff]  ;;  %v775_v9 = vld [vmem:[#allocation2 + $0x10] sm:$0xff]  ;;  %1552 = vmatpush3.msra.mxu1 %v1364_v15 }
 0x41b   :  { %v780_v13 = vrot.slane %v776_v8, 1  ;;  %v779_v14 = vrot.slane %v775_v9, 1  ;;  %v789_v17 = vrot.slane %v776_v8, 2  ;;  %v788_v18 = vrot.slane %v775_v9, 2  ;;  %1692 = vmatprep.subr.bf16.mxu1 %v2002_v59 }
 0x41d   :  { %784 = vrot.lane.b32.xlu1 %v780_v13, %s1856_s24  ;;  %v781_v16 = vsel %vm110_vm0, %v779_v14, %v780_v13  ;;  %v790_v23 = vsel %vm120_vm1, %v788_v18, %v789_v17  ;;  %v2192_v13 = vld [vmem:[%s2455_s2 + $0x6] ss:$0 sm:$0xff] }
 0x41e   :  { %782 = vrot.lane.b32.xlu0 %v781_v16, %s1856_s24  ;;  %s1861_s24 = smov 48  }
 0x421   :  { %793 = vrot.lane.b32.xlu1 %v789_v17, %s1858_s9 }
 0x422   :  { %791 = vrot.lane.b32.xlu0 %v790_v23, %s1858_s9 }
 0x425   :  { %494 = vrot.lane.b32.xlu1 %v490_v24, %s1860_s1 }
 0x426   :  { %492 = vrot.lane.b32.xlu0 %v491_v26, %s1860_s1 }
 0x429   :  { %503 = vrot.lane.b32.xlu1 %v499_v27, %s1861_s24 }
 0x42a   :  { %501 = vrot.lane.b32.xlu0 %v500_v29, %s1861_s24 }
 0x48f   :  { %v785_v30 = vpop.permute.xlu1 %784 }
 0x490   :  { %v783_v32 = vpop.permute.xlu0 %782  ;;  %v798_v37 = vsel %vm133_vm7, %v776_v8, %v785_v30 }
 0x491   :  { %v797_v35 = vsel %vm133_vm7, %v775_v9, %v783_v32 }
 0x493   :  { %v794_v33 = vpop.permute.xlu1 %793 }
 0x494   :  { %v792_v36 = vpop.permute.xlu0 %791  ;;  %v800_v39 = vsel %vm263_vm10, %v798_v37, %v794_v33 }
 0x495   :  { %v799_v38 = vsel %vm263_vm10, %v797_v35, %v792_v36 }
 0x496   :  { %1569 = vmatprep.mubr.msk.f32.mxu0 %vm266_vm11, %v799_v38 }
 0x497   :  { %v495_v40 = vpop.permute.xlu1 %494  ;;  %1570 = vmatmul.mubr.msk.f32.vlgmr.msra.gmra.mrb[4].mxu0 %vm266_vm11, %v800_v39 }
 0x498   :  { %v493_v41 = vpop.permute.xlu0 %492  ;;  %1706 = vmatpush3.bf16.msra.mxu0 %v2076_v43  ;;  %v508_v44 = vsel %vm266_vm11, %v486_v19, %v495_v40 }
 0x499   :  { %1708 = vmatprep.subr.bf16.mxu0 %v2107_v62  ;;  %v507_v10 = vsel %vm266_vm11, %v485_v20, %v493_v41 }
 0x49b   :  { %v504_v42 = vpop.permute.xlu1 %503 }
 0x49c   :  { %v502_v11 = vpop.permute.xlu0 %501  ;;  %1710 = vmatpush3.bf16.msra.mxu0 %v2107_v62  ;;  %v510_v46 = vsel %vm386_vm12, %v508_v44, %v504_v42 }
 0x49d   :  { %v509_v45 = vsel %vm386_vm12, %v507_v10, %v502_v11  ;;  %1712 = vmatprep.subr.bf16.mxu0 %v2119_v22 }
 0x49e   :  { %1553 = vmatprep.mubr.msk.f32.mxu1 %vm511_vm14, %v509_v45 }
 0x49f   :  { %1554 = vmatmul.mubr.msk.f32.vlgmr.msra.gmra.mrb[4].mxu1 %vm511_vm14, %v510_v46  ;;  %v73_v46 = vld [vmem:[%s2456_s3 + $0x80] sm:$0xff] }
 0x4a0   :  { %1694 = vmatpush3.bf16.msra.mxu1 %v2002_v59  ;;  %1714 = vmatpush3.bf16.msra.mxu0 %v2119_v22 }
 0x4a1   :  { %1696 = vmatprep.subr.bf16.mxu1 %v2007_v61  ;;  %1716 = vmatprep.subr.bf16.mxu0 %v1677_v7 }
 0x4a4   :  { %1698 = vmatpush3.bf16.msra.mxu1 %v2007_v61  ;;  %1718 = vmatpush3.bf16.msra.mxu0 %v1677_v7 }
 0x4a5   :  { %1700 = vmatprep.subr.bf16.mxu1 %v2024_v1  ;;  %1603 = vmatprep.subr.mxu0 %v1364_v15 }
 0x4a8   :  { %1702 = vmatpush3.bf16.msra.mxu1 %v2024_v1  ;;  %1604 = vmatpush3.msra.mxu0 %v1364_v15 }
 0x56a   :  { %v1571_v43 = vpop.f32.mrb[4].mxu0 }
 0x56b   :  { %v883_v47 = vmul.f32 %v1571_v43, %v2022_v0  ;;  %v873_v48 = vpop.f32.mrb[5].mxu0  ;;  %v74_v43 = vld [vmem:[%s2456_s3 + $0x88] sm:$0xff] }
 0x56c   :  { %v882_v59 = vmul.f32 %v2022_v0, %v873_v48  ;;  %v1719_v48 = vpack.c.bf16 %v74_v43, %v73_v46  ;;  %v69_v46 = vld [vmem:[%s2456_s3 + $0x60] sm:$0xff]  ;;  %v70_v43 = vld [vmem:[%s2456_s3 + $0x68] sm:$0xff] }
 0x56d   :  { %v885_v49 = vadd.f32 %v2029_v2, %v883_v47  ;;  %v57_v47 = vld [vmem:[%s2456_s3] sm:$0xff] }
 0x56e   :  { %v884_v50 = vadd.f32 %v2029_v2, %v882_v59  ;;  %v58_v59 = vld [vmem:[%s2456_s3 + $0x8] sm:$0xff]  ;;  %1720 = vmatprep.subr.bf16.mxu1 %v1719_v48 }
 0x56f   :  { %v887_v51 = vmax.f32 %v885_v49, 0.0  ;;  %v75_v49 = vld [vmem:[%s2456_s3 + $0x90] sm:$0xff] }
 0x570   :  { %v886_v52 = vmax.f32 %v884_v50, 0.0  ;;  %v76_v50 = vld [vmem:[%s2456_s3 + $0x98] sm:$0xff] }
 0x571   :  { %v891_v61 = vrot.slane %v887_v51, 1  ;;  %v900_v56 = vrot.slane %v887_v51, 2 }
 0x572   :  { %v2171_v53 = vpop.f32.mrb[4].mxu1  ;;  %v890_v54 = vrot.slane %v886_v52, 1  ;;  %v899_v57 = vrot.slane %v886_v52, 2 }
 0x573   :  { %895 = vrot.lane.b32.xlu1 %v891_v61, %s1858_s9  ;;  %v584_v1 = vpop.f32.mrb[5].mxu1 }
 0x574   :  { %v892_v55 = vsel %vm110_vm0, %v890_v54, %v891_v61  ;;  %v901_v0 = vsel %vm120_vm1, %v899_v57, %v900_v56  ;;  %v597_v16 = vmul.f32 %v2192_v13, %v584_v1  ;;  %v1723_v61 = vpack.c.bf16 %v76_v50, %v75_v49  ;;  %v59_v54 = vld [vmem:[%s2456_s3 + $0x10] sm:$0xff]  ;;  %v60_v1 = vld [vmem:[%s2456_s3 + $0x18] sm:$0xff]  ;;  %v77_v57 = vld [vmem:[%s2456_s3 + $0xa0] sm:$0xff] }
 0x575   :  { %893 = vrot.lane.b32.xlu0 %v892_v55, %s1858_s9  ;;  %v89_v55 = vld [vmem:[%s2456_s3 + $0x100] sm:$0xff]  ;;  %v100_v49 = vld [vmem:[%s2456_s3 + $0x158] sm:$0xff] }
 0x577   :  { %904 = vrot.lane.b32.xlu1 %v900_v56, %s1859_s30  ;;  %v90_v56 = vld [vmem:[%s2456_s3 + $0x108] sm:$0xff] }
 0x579   :  { %902 = vrot.lane.b32.xlu0 %v901_v0, %s1859_s30  ;;  %v78_v0 = vld [vmem:[%s2456_s3 + $0xa8] sm:$0xff] }
 0x5e5   :  { %v896_v2 = vpop.permute.xlu1 %895 }
 0x5e6   :  { %v909_v21 = vsel %vm263_vm10, %v887_v51, %v896_v2  ;;  %v1864_v51 = vmov 0.0|0.0   ;;  %v1725_v2 = vpack.c.bf16 %v60_v1, %v59_v54  ;;  %v87_v54 = vld [vmem:[%s2456_s3 + $0xf0] sm:$0xff]  ;;  %v88_v1 = vld [vmem:[%s2456_s3 + $0xf8] sm:$0xff] }
 0x5e7   :  { %v894_v58 = vpop.permute.xlu0 %893  ;;  %1751 = vmatprep.subr.bf16.mxu0 %v1864_v51 }
 0x5e8   :  { %v908_v62 = vsel %vm263_vm10, %v886_v52, %v894_v58  ;;  %v1721_v52 = vpack.c.bf16 %v58_v59, %v57_v47  ;;  %v1752_v58 = vpack.c.bf16 %v90_v56, %v89_v55  ;;  %v99_v47 = vld [vmem:[%s2456_s3 + $0x150] sm:$0xff]  ;;  %v1747_v56 = vpack.c.bf16 %v88_v1, %v87_v54 }
 0x5e9   :  { %v905_v60 = vpop.permute.xlu1 %904 }
 0x5ea   :  { %v911_v4 = vsel %vm18_vm5, %v909_v21, %v905_v60  ;;  %v91_v60 = vld [vmem:[%s2456_s3 + $0x110] sm:$0xff]  ;;  %v62_v21 = vld [vmem:[%s2456_s3 + $0x28] sm:$0xff] }
 0x5eb   :  { %v903_v63 = vpop.permute.xlu0 %902 }
 0x5ec   :  { %v910_v3 = vsel %vm18_vm5, %v908_v62, %v903_v63  ;;  %v1727_v62 = vpack.c.bf16 %v78_v0, %v77_v57  ;;  %v61_v63 = vld [vmem:[%s2456_s3 + $0x20] sm:$0xff]  ;;  %v72_v57 = vld [vmem:[%s2456_s3 + $0x78] sm:$0xff] }
 0x5ed   :  { %1584 = vmatprep.mubr.msk.f32.mxu1 %vm386_vm12, %v910_v3  ;;  %v92_v3 = vld [vmem:[%s2456_s3 + $0x118] sm:$0xff] }
 0x5ee   :  { %1585 = vmatmul.mubr.msk.f32.vlgmr.msra.gmra.mrb[6].mxu1 %vm386_vm12, %v911_v4  ;;  %v1755_v4 = vpack.c.bf16 %v92_v3, %v91_v60  ;;  %v102_v60 = vld [vmem:[%s2456_s3 + $0x168] sm:$0xff] }
 0x5ef   :  { %1722 = vmatpush3.bf16.msra.mxu1 %v1721_v52  ;;  %v1767_v52 = vpack.c.bf16 %v100_v49, %v99_v47 }
 0x5f0   :  { %1724 = vmatprep.subr.bf16.mxu1 %v1723_v61 }
 0x5f3   :  { %1726 = vmatpush3.bf16.msra.mxu1 %v1725_v2 }
 0x5f4   :  { %1728 = vmatprep.subr.bf16.mxu1 %v1727_v62 }
 0x6c1   :  { %v1586_v22 = vpop.f32.mrb[6].mxu1 }
 0x6c2   :  { %v994_v5 = vmul.f32 %v1586_v22, %v2084_v31  ;;  %v984_v6 = vpop.f32.mrb[7].mxu1  ;;  %v79_v22 = vld [vmem:[%s2456_s3 + $0xb0] sm:$0xff] }
 0x6c3   :  { %v993_v7 = vmul.f32 %v2084_v31, %v984_v6  ;;  %v2200_v31 = vld [vmem:[%s2455_s2 + $0x7] ss:$0 sm:$0xff]  ;;  %s1862_s2 = smov 96  }
 0x6c4   :  { %v996_v8 = vadd.f32 %v2089_v34, %v994_v5  ;;  %v80_v5 = vld [vmem:[%s2456_s3 + $0xb8] sm:$0xff]  ;;  %v93_v6 = vld [vmem:[%s2456_s3 + $0x120] sm:$0xff] }
 0x6c5   :  { %v995_v9 = vadd.f32 %v2089_v34, %v993_v7  ;;  %v603_v34 = vadd.f32 %v2200_v31, %v597_v16  ;;  %v94_v7 = vld [vmem:[%s2456_s3 + $0x128] sm:$0xff] }
 0x6c6   :  { %v998_v14 = vmax.f32 %v996_v8, 0.0  ;;  %v1729_v8 = vpack.c.bf16 %v62_v21, %v61_v63  ;;  %v1758_v16 = vpack.c.bf16 %v94_v7, %v93_v6 }
 0x6c7   :  { %v997_v15 = vmax.f32 %v995_v9, 0.0  ;;  %v2203_v19 = vmax.f32 %v603_v34, 0.0  ;;  %v1731_v9 = vpack.c.bf16 %v80_v5, %v79_v22  ;;  %v81_v34 = vld [vmem:[%s2456_s3 + $0xc0] sm:$0xff] }
 0x6c8   :  { %1000 = vst.msk [vmem:[#allocation2 + $0x1a] sm:$0xf] %vm483_vm13, %v998_v14  ;;  %v63_v14 = vld [vmem:[%s2456_s3 + $0x30] sm:$0xff]  ;;  %1730 = vmatpush3.bf16.msra.mxu1 %v1729_v8 }
 0x6c9   :  { %999 = vst.msk [vmem:[#allocation2 + $0x12] sm:$0xff] %vm266_vm11, %v997_v15  ;;  %v616_v27 = vrot.slane %v2203_v19, 3  ;;  %v630_v28 = vrot.slane %v2203_v19, 7  ;;  %v608_v29 = vrot.slane %v2203_v19, 1  ;;  %v622_v30 = vrot.slane %v2203_v19, 5  ;;  %v64_v15 = vld [vmem:[%s2456_s3 + $0x38] sm:$0xff]  ;;  %1732 = vmatprep.subr.bf16.mxu1 %v1731_v9 }
 0x6ca   :  { %v612_v36 = vrot.slane %v2203_v19, 2  ;;  %v626_v37 = vrot.slane %v2203_v19, 6  ;;  %v103_v9 = vld [vmem:[%s2456_s3 + $0x170] sm:$0xff] }
 0x6cb   :  { %v1798_v33 = vpack.i.bf16 %v616_v27, %v630_v28  ;;  %v1788_v35 = vpack.i.bf16 %v608_v29, %v622_v30  ;;  %v83_v28 = vld [vmem:[%s2456_s3 + $0xd0] sm:$0xff]  ;;  %v84_v29 = vld [vmem:[%s2456_s3 + $0xd8] sm:$0xff] }
 0x6cc   :  { %v1793_v38 = vpack.i.bf16 %v612_v36, %v626_v37  ;;  %v97_v36 = vld [vmem:[%s2456_s3 + $0x140] sm:$0xff]  ;;  %v598_v37 = vmul.f32 %v2171_v53, %v2192_v13 }
 0x6ce   :  { %v604_v48 = vadd.f32 %v2200_v31, %v598_v37 }
 0x6d0   :  { %v1002_v17 = vld [vmem:[#allocation2 + $0x18] sm:$0x3f]  ;;  %v1001_v18 = vld [vmem:[#allocation2 + $0x10] sm:$0xff]  ;;  %v2375_v0 = vmax.f32 %v604_v48, 0.0 }
 0x6d1   :  { %v1006_v20 = vrot.slane %v1002_v17, 1  ;;  %v1005_v23 = vrot.slane %v1001_v18, 1  ;;  %v1015_v25 = vrot.slane %v1002_v17, 2  ;;  %v1014_v26 = vrot.slane %v1001_v18, 2 }
 0x6d3   :  { %1010 = vrot.lane.b32.xlu1 %v1006_v20, %s1860_s1  ;;  %v1007_v24 = vsel %vm110_vm0, %v1005_v23, %v1006_v20  ;;  %v1016_v32 = vsel %vm120_vm1, %v1014_v26, %v1015_v25  ;;  %v96_v20 = vld [vmem:[%s2456_s3 + $0x138] sm:$0xff]  ;;  %v1733_v23 = vpack.c.bf16 %v64_v15, %v63_v14  ;;  %v66_v26 = vld [vmem:[%s2456_s3 + $0x48] sm:$0xff]  ;;  %v635_v15 = vrot.slane %v2375_v0, 1 }
 0x6d4   :  { %1008 = vrot.lane.b32.xlu0 %v1007_v24, %s1860_s1  ;;  %v104_v14 = vld [vmem:[%s2456_s3 + $0x178] sm:$0xff]  ;;  %vm648_vm0 = vcmask 523264   ;;  %vm650_vm1 = vcmask 785408  }
 0x6d5   :  { %1734 = vmatpush3.bf16.msra.mxu1 %v1733_v23 }
 0x6d7   :  { %1019 = vrot.lane.b32.xlu1 %v1015_v25, %s1861_s24  ;;  %v65_v25 = vld [vmem:[%s2456_s3 + $0x40] sm:$0xff] }
 0x6d8   :  { %1017 = vrot.lane.b32.xlu0 %v1016_v32, %s1861_s24  ;;  %v1737_v30 = vpack.c.bf16 %v66_v26, %v65_v25  ;;  %v1739_v32 = vpack.c.bf16 %v84_v29, %v83_v28 }
 0x6db   :  { %1799 = vrot.lane.b32.xlu1 %v1798_v33, %s1862_s2  ;;  %v67_v33 = vld [vmem:[%s2456_s3 + $0x50] sm:$0xff] }
 0x6dc   :  { %1789 = vrot.lane.b32.xlu0 %v1788_v35, %s1859_s30  ;;  %v68_v35 = vld [vmem:[%s2456_s3 + $0x58] sm:$0xff] }
 0x6e0   :  { %1794 = vrot.lane.b32.xlu0 %v1793_v38, %s1863_s6  ;;  %v1741_v38 = vpack.c.bf16 %v68_v35, %v67_v33 }
 0x745   :  { %v1011_v39 = vpop.permute.xlu1 %1010 }
 0x746   :  { %v1009_v40 = vpop.permute.xlu0 %1008  ;;  %v1024_v11 = vsel %vm266_vm11, %v1002_v17, %v1011_v39  ;;  %v82_v17 = vld [vmem:[%s2456_s3 + $0xc8] sm:$0xff] }
 0x747   :  { %v1023_v42 = vsel %vm266_vm11, %v1001_v18, %v1009_v40  ;;  %v95_v18 = vld [vmem:[%s2456_s3 + $0x130] sm:$0xff]  ;;  %v1735_v24 = vpack.c.bf16 %v82_v17, %v81_v34  ;;  %v98_v39 = vld [vmem:[%s2456_s3 + $0x148] sm:$0xff] }
 0x748   :  { %v1761_v27 = vpack.c.bf16 %v96_v20, %v95_v18  ;;  %v639_v20 = vrot.slane %v2375_v0, 2 }
 0x749   :  { %v1020_v41 = vpop.permute.xlu1 %1019  ;;  %1736 = vmatprep.subr.bf16.mxu1 %v1735_v24 }
 0x74a   :  { %v1018_v10 = vpop.permute.xlu0 %1017  ;;  %v1026_v45 = vsel %vm386_vm12, %v1024_v11, %v1020_v41  ;;  %1738 = vmatpush3.bf16.msra.mxu1 %v1737_v30  ;;  %v1764_v41 = vpack.c.bf16 %v98_v39, %v97_v36  ;;  %v85_v11 = vld [vmem:[%s2456_s3 + $0xe0] sm:$0xff] }
 0x74b   :  { %v1025_v44 = vsel %vm386_vm12, %v1023_v42, %v1018_v10  ;;  %1740 = vmatprep.subr.bf16.mxu1 %v1739_v32 }
 0x74c   :  { %1605 = vmatprep.mubr.msk.f32.mxu0 %vm511_vm14, %v1025_v44  ;;  %v86_v44 = vld [vmem:[%s2456_s3 + $0xe8] sm:$0xff] }
 0x74d   :  { %1606 = vmatmul.mubr.msk.f32.vlgmr.msra.gmra.mrb[6].mxu0 %vm511_vm14, %v1026_v45  ;;  %v1743_v45 = vpack.c.bf16 %v86_v44, %v85_v11 }
 0x74e   :  { %1753 = vmatpush3.bf16.msra.mxu0 %v1752_v58  ;;  %1742 = vmatpush3.bf16.msra.mxu1 %v1741_v38  ;;  %v101_v58 = vld [vmem:[%s2456_s3 + $0x160] sm:$0xff]  ;;  %v1790_v25 = vpop.permute.xlu0 %1789  ;;  %v620_v38 = vrot.slane %v2203_v19, 4 }
 0x74f   :  { %1754 = vmatprep.subr.bf16.mxu0 %v1864_v51  ;;  %1744 = vmatprep.subr.bf16.mxu1 %v1743_v45  ;;  %v1770_v8 = vpack.c.bf16 %v102_v60, %v101_v58  ;;  %v1791_v28 = vunpack.i.l.bf16 %v1790_v25 }
 0x750   :  { %1640 = vmatprep.mubr.msk.f32.mxu0 %vm1865_vm15, %v1857_v12  ;;  %v643_v12 = vrot.slane %v2375_v0, 3 }
 0x751   :  { %v652_v44 = vsel %vm18_vm5, %v620_v38, %v1791_v28 }
 0x752   :  { %1756 = vmatpush3.bf16.msra.mxu0 %v1755_v4  ;;  %v1795_v26 = vpop.permute.xlu0 %1794 }
 0x753   :  { %1757 = vmatprep.subr.bf16.mxu0 %v1864_v51  ;;  %v1797_v29 = vunpack.i.h.bf16 %v1795_v26  ;;  %v1796_v33 = vunpack.i.l.bf16 %v1795_v26 }
 0x755   :  { %v653_v48 = vsel %vm648_vm0, %v652_v44, %v1796_v33 }
 0x756   :  { %1759 = vmatpush3.bf16.msra.mxu0 %v1758_v16  ;;  %v1773_v16 = vpack.c.bf16 %v104_v14, %v103_v9  ;;  %v1395_v14 = vld [vmem:[%s2456_s3 + $0x180] ss:$0 sm:$0xff] }
 0x757   :  { %1760 = vmatprep.subr.bf16.mxu0 %v1864_v51 }
 0x75a   :  { %1762 = vmatpush3.bf16.msra.mxu0 %v1761_v27  ;;  %v1792_v27 = vunpack.i.h.bf16 %v1790_v25 }
 0x75b   :  { %1763 = vmatprep.subr.bf16.mxu0 %v1864_v51 }
 0x75c   :  { %v647_v11 = vsel %vm18_vm5, %v2203_v19, %v1792_v27 }
 0x75e   :  { %1765 = vmatpush3.bf16.msra.mxu0 %v1764_v41 }
 0x75f   :  { %1766 = vmatprep.subr.bf16.mxu0 %v1864_v51 }
 0x762   :  { %1768 = vmatpush3.bf16.msra.mxu0 %v1767_v52 }
 0x763   :  { %1769 = vmatprep.subr.bf16.mxu0 %v1864_v51 }
 0x766   :  { %1771 = vmatpush3.bf16.msra.mxu0 %v1770_v8 }
 0x767   :  { %1772 = vmatprep.subr.bf16.mxu0 %v1864_v51  ;;  %v1800_v51 = vpop.permute.xlu1 %1799 }
 0x768   :  { %v1801_v52 = vunpack.i.l.bf16 %v1800_v51 }
 0x76a   :  { %1774 = vmatpush3.bf16.msra.mxu0 %v1773_v16 }
 0x820   :  { %v1607_v40 = vpop.f32.mrb[6].mxu0 }
 0x821   :  { %v1109_v42 = vmul.f32 %v1607_v40, %v2192_v13  ;;  %v1099_v10 = vpop.f32.mrb[7].mxu0 }
 0x822   :  { %v1108_v53 = vmul.f32 %v2192_v13, %v1099_v10  ;;  %v1745_v13 = vpack.c.bf16 %v70_v43, %v69_v46  ;;  %v1802_v10 = vunpack.i.h.bf16 %v1800_v51  ;;  %v649_v46 = vsel %vm648_vm0, %v647_v11, %v1797_v29 }
 0x823   :  { %v1111_v59 = vadd.f32 %v2200_v31, %v1109_v42 }
 0x824   :  { %v1110_v50 = vadd.f32 %v2200_v31, %v1108_v53  ;;  %1746 = vmatpush3.bf16.msra.mxu1 %v1745_v13  ;;  %v71_v31 = vld [vmem:[%s2456_s3 + $0x70] sm:$0xff]  ;;  %v651_v58 = vsel %vm650_vm1, %v649_v46, %v1802_v10 }
 0x825   :  { %v2359_v61 = vmax.f32 %v1111_v59, 0.0  ;;  %v1749_v2 = vpack.c.bf16 %v72_v57, %v71_v31  ;;  %1748 = vmatprep.subr.bf16.mxu1 %v1747_v56 }
 0x826   :  { %v2367_v55 = vmax.f32 %v1110_v50, 0.0 }
 0x827   :  { %v1142_v22 = vrot.slane %v2359_v61, 1  ;;  %v1146_v18 = vrot.slane %v2359_v61, 2  ;;  %v1150_v24 = vrot.slane %v2359_v61, 3 }
 0x828   :  { %v1119_v62 = vrot.slane %v2367_v55, 2  ;;  %v1133_v63 = vrot.slane %v2367_v55, 6  ;;  %v1115_v21 = vrot.slane %v2367_v55, 1  ;;  %v1129_v3 = vrot.slane %v2367_v55, 5  ;;  %1750 = vmatpush3.bf16.msra.mxu1 %v1749_v2 }
 0x829   :  { %v1123_v4 = vrot.slane %v2367_v55, 3  ;;  %v1137_v7 = vrot.slane %v2367_v55, 7  ;;  %v1808_v17 = vpack.i.bf16 %v635_v15, %v1142_v22  ;;  %v1823_v23 = vpack.i.bf16 %v639_v20, %v1146_v18 }
 0x82a   :  { %v1813_v5 = vpack.i.bf16 %v1119_v62, %v1133_v63  ;;  %v1803_v6 = vpack.i.bf16 %v1115_v21, %v1129_v3  ;;  %v1127_v35 = vrot.slane %v2367_v55, 4  ;;  %v654_v2 = vsel %vm650_vm1, %v653_v48, %v1801_v52 }
 0x82b   :  { %v1818_v34 = vpack.i.bf16 %v1123_v4, %v1137_v7 }
 0x82c   :  { %1814 = vrot.lane.b32.xlu1 %v1813_v5, %s1863_s6  ;;  %1804 = vrot.lane.b32.xlu0 %v1803_v6, %s1859_s30 }
 0x830   :  { %1819 = vrot.lane.b32.xlu1 %v1818_v34, %s1862_s2  ;;  %1809 = vrot.lane.b32.xlu0 %v1808_v17, %s1859_s30 }
 0x834   :  { %1824 = vrot.lane.b32.xlu1 %v1823_v23, %s1863_s6  ;;  %1151 = vrot.lane.b32.xlu0 %v1150_v24, %s1862_s2  ;;  %s1866_s6 = smov [#allocation3]  }
 0x835   :  { %s1335_s26 = sshll.u32 %s1866_s6, 4  ;;  %s1336_s26 = int_to_ptr.vmem [resolvable:$true] %s1335_s26 }
 0x836   :  { %s1830_s27 = scalar_lea.vmem %s1336_s26, 32  ;;  %p1835_p1 = scmp.lt.s32.totalorder %s1336_s26, %s1336_s26 }
 0x837   :  { %p1831_p0 = scmp.ne.s32.totalorder %s1336_s26, %s1830_s27  ;;  %p1836_p2 = scmp.lt.s32.totalorder %s1830_s27, %s1830_s27 }
 0x838   :  { %644 = vrot.lane.b32.xlu1 %v643_v12, %s1862_s2 }
 0x839   :  { %p1837_p3 = por %p1836_p2, %p1835_p1 }
 0x83b   :  { %p1838_p4 = pnand %p1837_p3, %p1831_p0 }
 0x89e   :  { %v1815_v30 = vpop.permute.xlu1 %1814  ;;  %v1805_v32 = vpop.permute.xlu0 %1804 }
 0x89f   :  { %v1807_v36 = vunpack.i.h.bf16 %v1805_v32  ;;  %v1806_v37 = vunpack.i.l.bf16 %v1805_v32  ;;  %v1817_v39 = vunpack.i.h.bf16 %v1815_v30  ;;  %v1816_v40 = vunpack.i.l.bf16 %v1815_v30 }
 0x8a1   :  { %v1154_v41 = vsel %vm18_vm5, %v2367_v55, %v1807_v36  ;;  %v1157_v42 = vsel %vm18_vm5, %v1127_v35, %v1806_v37 }
 0x8a2   :  { %v1820_v53 = vpop.permute.xlu1 %1819  ;;  %v1810_v45 = vpop.permute.xlu0 %1809  ;;  %v1155_v59 = vsel %vm648_vm0, %v1154_v41, %v1817_v39  ;;  %v1158_v13 = vsel %vm648_vm0, %v1157_v42, %v1816_v40 }
 0x8a3   :  { %v1822_v43 = vunpack.i.h.bf16 %v1820_v53  ;;  %v1821_v47 = vunpack.i.l.bf16 %v1820_v53  ;;  %v1812_v49 = vunpack.i.h.bf16 %v1810_v45  ;;  %v1811_v50 = vunpack.i.l.bf16 %v1810_v45 }
 0x8a5   :  { %v1156_v19 = vsel %vm650_vm1, %v1155_v59, %v1822_v43  ;;  %v1159_v54 = vsel %vm650_vm1, %v1158_v13, %v1821_v47  ;;  %v1160_v60 = vsel %vm18_vm5, %v2359_v61, %v1811_v50  ;;  %v655_v63 = vsel %vm18_vm5, %v2375_v0, %v1812_v49 }
 0x8a6   :  { %v1166_v1 = vrot.slane %v1156_v19, 7  ;;  %v1825_v55 = vpop.permute.xlu1 %1824  ;;  %v1167_v56 = vrot.slane %v1159_v54, 7  ;;  %v1152_v3 = vpop.permute.xlu0 %1151 }
 0x8a7   :  { %v1827_v31 = vunpack.i.h.bf16 %v1825_v55  ;;  %v1826_v57 = vunpack.i.l.bf16 %v1825_v55 }
 0x8a8   :  { %v1174_v62 = vsel %vm1172_vm2, %v654_v2, %v1167_v56  ;;  %v1173_v21 = vsel %vm1172_vm2, %v651_v58, %v1166_v1 }
 0x8a9   :  { %v1161_v4 = vsel %vm648_vm0, %v1160_v60, %v1826_v57  ;;  %1244 = vmatprep.mubr.f32.mxu1 %v1174_v62  ;;  %v656_v22 = vsel %vm648_vm0, %v655_v63, %v1827_v31 }
 0x8aa   :  { %v1162_v5 = vsel %vm650_vm1, %v1161_v4, %v1152_v3  ;;  %v645_v6 = vpop.permute.xlu1 %644  ;;  %1245 = vmatmul.mubr.f32.vlgmr.msra.gmra.mrb[8].mxu1 %v1173_v21 }
 0x8ab   :  { %v1168_v7 = vrot.slane %v1162_v5, 7  ;;  %v657_v61 = vsel %vm650_vm1, %v656_v22, %v645_v6 }
 0x8ad   :  { %v1175_v8 = vsel %vm1172_vm2, %v657_v61, %v1168_v7 }
 0x8ae   :  { %1641 = vmatmul.mubr.f32.vlgmr.msra.gmra.mrb[8].mxu0 %v1175_v8 }
 0x97d   :  { %v1484_v9 = vpop.f32.mrb[8].mxu1 }
 0x97e   :  { %v1485_v0 = vpop.f32.mrb[9].mxu1 }
 0x97f   :  { %v1486_v15 = vadd.f32 %v1485_v0, %v1484_v9 }
 0x981   :  { %v1247_v16 = vadd.f32 %v1486_v15, %v1395_v14  ;;  %v1316_v34 = vpop.f32.mrb[8].mxu0 }
 0x982   :  { %v1642_v17 = vpop.f32.mrb[9].mxu0 }
 0x983   :  { %v1317_v18 = vadd.f32 %v1316_v34, %v1247_v16 }
 0x985   :  { %v1320_v20 = vmul.f32 %v1317_v18, %v1317_v18 }
 0x987   :  { %v1322_v23 = vsel %vm1321_vm3, %v1320_v20, 0.0 }
 0x988   :  { %1323 = vadd.xlane.f32.xlu0 %v1322_v23 }
 0xa15   :  { %v1324_v24 = vpop.xlane.xlu0 %1323 }
 0xa16   :  { %v1325_v12 = vmax.f32 %v1324_v24, 1e-24 }
 0xa18   :  { %1828 = vrsqrt.f32 %v1325_v12 }
 0xa22   :  { %v1829_v25 = vpop.eup %1828 }
 0xa23   :  { %v1327_v51 = vmul.f32 %v1829_v25, %v1317_v18 }
 0xa25   :  { %1328 = vst.msk [vmem:[#allocation3] sm:$0x3] %vm1321_vm3, %v1327_v51 }
 0xa26   :  { %1841 = shalt.err (!%p1838_p4)
}
 0xa27   :  { %s1842_s24 = scalar_lea.hbm %s2457_s4, 32 }
 0xa28   :  { %p1843_p5 = scmp.ne.s32.totalorder %s2457_s4, %s1842_s24  ;;  %p1846_p6 = scmp.lt.u32.totalorder %s1842_s24, %s2457_s4 }
 0xa2a   :  { %p1848_p7 = pnand %p1846_p6, %p1843_p5 }
 0xa2c   :  { %1851 = shalt.err (!%p1848_p7)
}
 0xa2d   :  { %1338 = dma.vmem_to_hbm [thread:$0]  %s1336_s26, 32, %s2457_s4, [#allocation4]  }
 0xa2e   :  { %1852 = dma.done.wait [#allocation4], 32  }
 0xa2f   :  { %1853 = vsyncadd [#allocation4], 4294967264 }
 0xa30   :  { %1342 = vsyncpa [#allocation4], 1 }

</bundles_post_ra>
